<compile_context>
chip_gen: v7x
topology: tpu7x:2x2x1
jax: 0.10.0
libtpu: 0.0.40
codegen_flags: <defaults>
</compile_context>

<pallas_src>
import jax
import jax.numpy as jnp
from jax import lax
from jax.experimental import pallas as pl
from jax.experimental.pallas import tpu as pltpu


def _round_up(n, m):
    return ((n + m - 1) // m) * m


def linear_sigmoid_kernel(x_ref, w_ref, b_ref, o_ref):
    # x_ref: (TB, D) VMEM   w_ref: (1, D) VMEM   b_ref: (1, 1) SMEM   o_ref: (1, TB) VMEM
    x = x_ref[...]
    w = w_ref[...]
    b = b_ref[0, 0]                                   # scalar read from SMEM
    # MXU matmul contracting both operands on the feature dim: (1, D) x (TB, D) -> (1, TB).
    # The K-reduction happens on the MXU (no XLU lane reduce) and the result is already
    # lane-dense (batch on lanes), so no transpose is needed before the store.
    z = lax.dot_general(
        w, x, (((1,), (1,)), ((), ())),
        precision=lax.Precision.HIGHEST,              # full-f32 passes; kernel stays HBM-bound
        preferred_element_type=jnp.float32,
    ) + b
    o_ref[...] = jax.nn.sigmoid(z).astype(o_ref.dtype)    # EUP


def _pick_batch_tile(B, D, itemsize):
    """Rows of x per grid step."""
    # ~4 MiB per x tile: big enough to amortize ~0.35us/step pipeline overhead and sit near
    # HBM roofline, small enough that 2x double-buffered tiles (+ resident weight) fit
    # every generation's scoped VMEM (v5e 16 MiB, v6e/v7x 32 MiB defaults).
    row_bytes = max(1, D * itemsize)
    cap = max(128, ((4 << 20) // row_bytes) // 128 * 128)
    cap = min(cap, 8192)
    if B <= 128:
        return B            # single grid step; block == full array dims (any B, D legal)
    # Aim for >= ~4 grid steps so the "parallel" batch axis keeps both v7x TensorCores busy,
    # while keeping TB a multiple of 128 (lane-dense (1, TB) output block stays legal).
    want = _round_up(pl.cdiv(B, 4), 128)
    return min(cap, want)


def linear_classification_forward(x, weight, bias):
    """Pallas equivalent of torch.sigmoid(nn.Linear(input_dim, 1)(x)).

    x: (B, D); weight: (1, D) (PyTorch layout); bias: (1,). Returns (B, 1) float32.
    """
    B, D = x.shape
    itemsize = jnp.dtype(x.dtype).itemsize
    TB = _pick_batch_tile(B, D, itemsize)
    num_tiles = pl.cdiv(B, TB)

    w = weight.reshape(1, D).astype(x.dtype)
    b_smem = bias.reshape(1, 1).astype(jnp.float32)

    # Explicit VMEM budget (padded (8,128)-tile footprints, double-buffered by Pallas):
    x_tile = _round_up(TB, 8) * _round_up(D, 128) * itemsize
    w_tile = _round_up(D, 128) * 32                   # (1, D) f32 -> ceil(D/128) 4 KiB tiles
    o_tile = _round_up(TB, 128) * 32
    vmem_limit = int(min(max(2 * (x_tile + w_tile + o_tile) + (4 << 20), 16 << 20), 32 << 20))
    # TODO(synk): for very large input_dim (>~30K features) even the minimum 128-row tile no
    # longer fits double-buffered in scoped VMEM; add a trailing "arbitrary" K-axis grid
    # dimension with a VMEM accumulator instead of shrinking TB below 128.

    out = pl.pallas_call(
        linear_sigmoid_kernel,
        out_shape=jax.ShapeDtypeStruct((1, B), jnp.float32),
        grid=(num_tiles,),
        in_specs=[
            pl.BlockSpec((TB, D), lambda i: (i, 0)),               # x: one batch tile / step
            pl.BlockSpec((1, D), lambda i: (0, 0)),                # weight: resident
            pl.BlockSpec(memory_space=pltpu.MemorySpace.SMEM),     # bias: SMEM scalar
        ],
        out_specs=pl.BlockSpec((1, TB), lambda i: (0, i)),         # lane-dense output block
        compiler_params=pltpu.CompilerParams(
            dimension_semantics=("parallel",),                     # shard batch across TCs
            vmem_limit_bytes=vmem_limit,
        ),
    )(x, w, b_smem)

    return out.reshape(B, 1)


def _reference(x, weight, bias):
    return jax.nn.sigmoid(
        jnp.dot(x, weight.T, precision=lax.Precision.HIGHEST) + bias)


if __name__ == "__main__":
    key = jax.random.PRNGKey(0)

    # --- Small toy case matching the module (input_dim=32, batch=8): single-step grid ---
    kx, kw, kb = jax.random.split(key, 3)
    B, D = 8, 32
    x = jax.random.normal(kx, (B, D), dtype=jnp.float32)
    bound = 1.0 / (D ** 0.5)
    weight = jax.random.uniform(kw, (1, D), minval=-bound, maxval=bound, dtype=jnp.float32)
    bias = jax.random.uniform(kb, (1,), minval=-bound, maxval=bound, dtype=jnp.float32)

    out = jax.block_until_ready(linear_classification_forward(x, weight, bias))
    ref = _reference(x, weight, bias)
    assert out.shape == (B, 1)
    # Tolerance leaves slack for MXU pass-precision differences vs the XLA reference.
    assert jnp.allclose(out, ref, atol=2e-3, rtol=2e-3)

    # --- Second case: multi-tile grid, unaligned feature dim, partial edge batch block ---
    k2x, k2w, k2b = jax.random.split(jax.random.PRNGKey(1), 3)
    B2, D2 = 1100, 72
    x2 = jax.random.normal(k2x, (B2, D2), dtype=jnp.float32)
    bound2 = 1.0 / (D2 ** 0.5)
    weight2 = jax.random.uniform(k2w, (1, D2), minval=-bound2, maxval=bound2, dtype=jnp.float32)
    bias2 = jax.random.uniform(k2b, (1,), minval=-bound2, maxval=bound2, dtype=jnp.float32)

    out2 = jax.block_until_ready(linear_classification_forward(x2, weight2, bias2))
    ref2 = _reference(x2, weight2, bias2)
    assert out2.shape == (B2, 1)
    assert jnp.allclose(out2, ref2, atol=2e-3, rtol=2e-3)

    print("KERNEL_OK")
</pallas_src>

<mosaic_0001>
module attributes {stable_mosaic.version = 11 : i64} {
  func.func @linear_sigmoid_kernel(%arg0: i32, %arg1: memref<8x32xf32, #tpu.memory_space<vmem>>, %arg2: memref<1x32xf32, #tpu.memory_space<vmem>>, %arg3: memref<1x1xf32, #tpu.memory_space<smem>>, %arg4: memref<1x8xf32, #tpu.memory_space<vmem>>) attributes {dimension_semantics = [#tpu.dimension_semantics<parallel>], iteration_bounds = array<i64: 1>, scalar_prefetch = 0 : i64, scratch_operands = 0 : i64, tpu.core_type = #tpu.core_type<tc>, window_params = [{transform_indices = @transform_0, window_bounds = array<i64: 8, 32>}, {pipeline_mode = #tpu.pipeline_mode<synchronous>, transform_indices = @transform_1, window_bounds = array<i64: 1, 32>}, {transform_indices = @transform_2, window_bounds = array<i64: 1, 1>}, {transform_indices = @transform_3, window_bounds = array<i64: 1, 8>}]} {
    %c0 = arith.constant 0 : index
    %c0_0 = arith.constant 0 : index
    %0 = vector.load %arg1[%c0, %c0_0] : memref<8x32xf32, #tpu.memory_space<vmem>>, vector<8x32xf32>
    %c0_1 = arith.constant 0 : index
    %c0_2 = arith.constant 0 : index
    %1 = vector.load %arg2[%c0_1, %c0_2] : memref<1x32xf32, #tpu.memory_space<vmem>>, vector<1x32xf32>
    %c0_3 = arith.constant 0 : index
    %c0_4 = arith.constant 0 : index
    %2 = memref.load %arg3[%c0_3, %c0_4] : memref<1x1xf32, #tpu.memory_space<smem>>
    %cst = arith.constant dense<0.000000e+00> : vector<1x8xf32>
    %3 = tpu.matmul %1, %0, %cst {dimension_numbers = #tpu.dot_dimension_numbers<[1], [1], [0], [0], [0, 0, 1, 0], [], []>, precision = #tpu.contract_precision<fp32>} : vector<1x32xf32>, vector<8x32xf32>, vector<1x8xf32> -> vector<1x8xf32>
    %4 = vector.broadcast %2 : f32 to vector<1x8xf32>
    %5 = arith.addf %3, %4 : vector<1x8xf32>
    %6 = arith.negf %5 : vector<1x8xf32>
    %7 = math.exp %6 : vector<1x8xf32>
    %cst_5 = arith.constant 1.000000e+00 : f32
    %8 = vector.broadcast %cst_5 : f32 to vector<1x8xf32>
    %9 = arith.addf %8, %7 : vector<1x8xf32>
    %10 = arith.divf %8, %9 : vector<1x8xf32>
    %c0_6 = arith.constant 0 : index
    %c0_7 = arith.constant 0 : index
    %11 = vector.load %arg4[%c0_6, %c0_7] : memref<1x8xf32, #tpu.memory_space<vmem>>, vector<1x8xf32>
    tpu.vector_store %arg4[%c0_6, %c0_7], %10 {strides = array<i32>} : memref<1x8xf32, #tpu.memory_space<vmem>>, vector<1x8xf32>,
    return
  }
  func.func @transform_0(%arg0: i32) -> (i32, i32) {
    %c0_i32 = arith.constant 0 : i32
    %c0_i32_0 = arith.constant 0 : i32
    return %arg0, %c0_i32 : i32, i32
  }
  func.func @transform_1(%arg0: i32) -> (i32, i32) {
    %c0_i32 = arith.constant 0 : i32
    %c0_i32_0 = arith.constant 0 : i32
    %c0_i32_1 = arith.constant 0 : i32
    return %c0_i32, %c0_i32_0 : i32, i32
  }
  func.func @transform_2(%arg0: i32) -> (i32, i32) {
    %c0_i32 = arith.constant 0 : i32
    %c0_i32_0 = arith.constant 0 : i32
    %c0_i32_1 = arith.constant 0 : i32
    return %c0_i32, %c0_i32_0 : i32, i32
  }
  func.func @transform_3(%arg0: i32) -> (i32, i32) {
    %c0_i32 = arith.constant 0 : i32
    %c0_i32_0 = arith.constant 0 : i32
    return %c0_i32, %arg0 : i32, i32
  }
}

</mosaic_0001>

<bundles_post_ra>
// kernel: tpu_custom_call.1
= control target key start
LH: loop header
LB: loop body
LE: loop exit
PB: predicated region body
PF: predicated region fallthrough
CT: control target
= control target key end

     0   :  { %9 = vsyncpa [#allocation4], 0  ;;  %s677_s0 = inlined_call_operand.hbm [shape: f32[8,32], index: 0, kind: input, shape index: {}]   ;;  %s678_s1 = inlined_call_operand.vmem [shape: f32[1,32], index: 1, kind: input, shape index: {}]   ;;  %s679_s2 = inlined_call_operand.<no memory space> [shape: f32[1,1], index: 2, kind: input, shape index: {}]   ;;  %s680_s3 = inlined_call_operand.hbm [shape: f32[1,8], index: 3, kind: output, shape index: {}]  }
   0x1   :  { %10 = vsyncpa [#allocation5], 0  ;;  %s617_s12 = smov [#allocation3]   ;;  %s569_s16 = scalar_lea.hbm %s677_s0, 128 }
   0x2   :  { %s17_s13 = sshll.u32 %s617_s12, 4  ;;  %p570_p0 = scmp.ne.s32.totalorder %s677_s0, %s569_s16  ;;  %s18_s13 = int_to_ptr.vmem [resolvable:$true] %s17_s13 }
   0x3   :  { %p573_p1 = scmp.lt.u32.totalorder %s569_s16, %s677_s0 }
   0x5   :  { %p575_p2 = pnand %p573_p1, %p570_p0 }
   0x7   :  { %578 = shalt.err (!%p575_p2)
}
   0x8   :  { %s579_s21 = scalar_lea.vmem %s18_s13, 128  ;;  %p584_p4 = scmp.lt.s32.totalorder %s18_s13, %s18_s13 }
   0x9   :  { %p580_p3 = scmp.ne.s32.totalorder %s18_s13, %s579_s21  ;;  %p585_p5 = scmp.lt.s32.totalorder %s579_s21, %s579_s21 }
   0xb   :  { %p586_p6 = por %p585_p5, %p584_p4 }
   0xd   :  { %p587_p7 = pnand %p586_p6, %p580_p3 }
   0xf   :  { %590 = shalt.err (!%p587_p7)
}
  0x10   :  { %20 = dma.hbm_to_vmem [thread:$0]  %s677_s0, 128, %s18_s13, [#allocation4]  }
  0x11   :  { %613 = dma.done.wait [#allocation4], 128  }
  0x12   :  { %614 = vsyncadd [#allocation4], 4294967168  ;;  %v618_v0 = vmov 0.0   ;;  %vm619_vm0 = vmmov 0   ;;  %vm32_vm1 = vcmask 261120   ;;  %v28_v1 = vld [vmem:[#allocation3] sm:$0xff]  ;;  %v31_v17 = vstv %s679_s2 }
  0x13   :  { %536 = vmatprep.subr.mxu0 %v618_v0  ;;  %521 = vmatprep.subr.mxu1 %v618_v0  ;;  %v29_v2 = vld [vmem:[%s678_s1] sm:$0x1]  ;;  %v37_v3 = vsel %vm32_vm1, %v28_v1, 0  ;;  %s620_s26 = smov [#allocation6]   ;;  %vm491_vm2 = vcmask 57344  }
  0x14   :  { %538 = vmatprep.mubr.msk.f32.mxu0 %vm619_vm0, %v618_v0  ;;  %523 = vmatprep.mubr.msk.f32.mxu1 %vm619_vm0, %v618_v0  ;;  %v34_v4 = vsel %vm32_vm1, %v29_v2, 0  ;;  %v40_v5 = vand.u32 4294901760, %v37_v3  ;;  %s499_s27 = sshll.u32 %s620_s26, 4  ;;  %s500_s27 = int_to_ptr.vmem [resolvable:$true] %s499_s27 }
  0x15   :  { %v105_v6 = vand.u32 4294901760, %v34_v4  ;;  %s591_s28 = scalar_lea.vmem %s500_s27, 16  ;;  %s595_s29 = scalar_lea.vmem %s500_s27, 32 }
  0x16   :  { %v117_v7 = vsub.f32 %v37_v3, %v40_v5  ;;  %537 = vmatpush3.xpose.msra.mxu0 %v40_v5  ;;  %522 = vmatpush3.xpose.msra.mxu1 %v40_v5  ;;  %p592_p8 = scmp.ne.s32.totalorder %s500_s27, %s591_s28  ;;  %p596_p9 = scmp.lt.s32.totalorder %s500_s27, %s500_s27 }
  0x17   :  { %v106_v8 = vsub.f32 %v34_v4, %v105_v6  ;;  %526 = vmatprep.subr.mxu1 %v618_v0  ;;  %541 = vmatprep.subr.mxu0 %v618_v0  ;;  %p597_p10 = scmp.lt.s32.totalorder %s595_s29, %s591_s28 }
  0x18   :  { %v118_v10 = vand.u32 4294901760, %v117_v7 }
  0x19   :  { %v107_v9 = vand.u32 4294901760, %v106_v8  ;;  %p598_p11 = por %p597_p10, %p596_p9 }
  0x1a   :  { %v119_v12 = vsub.f32 %v117_v7, %v118_v10 }
  0x1b   :  { %539 = vmatmul.mubr.f32.vlgmr.msra.gmra.mrb[0].mxu0 %v107_v9  ;;  %v108_v11 = vsub.f32 %v106_v8, %v107_v9  ;;  %p599_p12 = pnand %p598_p11, %p592_p8 }
  0x1c   :  { %542 = vmatpush3.xpose.msra.mxu0 %v118_v10  ;;  %543 = vmatprep.mubr.msk.f32.mxu0 %vm619_vm0, %v618_v0  ;;  %v120_v14 = vand.u32 4294901760, %v119_v12 }
  0x1d   :  { %v109_v13 = vand.u32 4294901760, %v108_v11  ;;  %546 = vmatprep.subr.mxu0 %v618_v0 }
  0x1f   :  { %524 = vmatmul.mubr.f32.vlgmr.msra.gmra.mrb[0].mxu1 %v109_v13 }
  0x20   :  { %527 = vmatpush3.xpose.msra.mxu1 %v120_v14  ;;  %528 = vmatprep.mubr.msk.f32.mxu1 %vm619_vm0, %v618_v0 }
  0x21   :  { %531 = vmatprep.subr.mxu1 %v618_v0 }
  0x23   :  { %544 = vmatmul.mubr.f32.vlgmr.msra.gmra.mrb[0].mxu0 %v105_v6 }
  0x24   :  { %547 = vmatpush3.xpose.msra.mxu0 %v40_v5  ;;  %548 = vmatprep.mubr.msk.f32.mxu0 %vm619_vm0, %v618_v0 }
  0x27   :  { %529 = vmatmul.mubr.f32.vlgmr.msra.gmra.mrb[0].mxu1 %v105_v6 }
  0x28   :  { %532 = vmatpush3.xpose.msra.mxu1 %v117_v7  ;;  %533 = vmatprep.mubr.msk.f32.mxu1 %vm619_vm0, %v618_v0 }
  0x2b   :  { %549 = vmatmul.mubr.f32.vlgmr.msra.gmra.mrb[0].mxu0 %v105_v6 }
  0x2f   :  { %534 = vmatmul.mubr.f32.vlgmr.msra.gmra.mrb[0].mxu1 %v106_v8 }
  0xfe   :  { %v481_v15 = vpop.f32.mrb[0].mxu0 }
  0xff   :  { %v550_v16 = vpop.f32.mrb[1].mxu0 }
 0x102   :  { %v261_v18 = vpop.f32.mrb[0].mxu1 }
 0x103   :  { %v551_v19 = vadd.f32 %v261_v18, %v31_v17  ;;  %v535_v20 = vpop.f32.mrb[1].mxu1 }
 0x105   :  { %v552_v21 = vadd.f32 %v551_v19, %v481_v15 }
 0x107   :  { %v508_v22 = vmul.f32 -1.442695, %v552_v21 }
 0x109   :  { %565 = vpow2.f32 %v508_v22 }
 0x113   :  { %v566_v23 = vpop.eup %565 }
 0x114   :  { %v488_v24 = vadd.f32 1.0, %v566_v23 }
 0x116   :  { %567 = vrcp.f32 %v488_v24 }
 0x120   :  { %v568_v25 = vpop.eup %567 }
 0x121   :  { %492 = vst.msk [vmem:[#allocation6] sm:$0x1] %vm491_vm2, %v568_v25 }
 0x122   :  { %602 = shalt.err (!%p599_p12)
}
 0x123   :  { %s603_s4 = scalar_lea.hbm %s680_s3, 16 }
 0x124   :  { %p604_p13 = scmp.ne.s32.totalorder %s680_s3, %s603_s4  ;;  %p607_p0 = scmp.lt.u32.totalorder %s603_s4, %s680_s3 }
 0x126   :  { %p609_p1 = pnand %p607_p0, %p604_p13 }
 0x128   :  { %612 = shalt.err (!%p609_p1)
}
 0x129   :  { %502 = dma.vmem_to_hbm [thread:$0]  %s500_s27, 16, %s680_s3, [#allocation5]  }
 0x12a   :  { %615 = dma.done.wait [#allocation5], 16  }
 0x12b   :  { %616 = vsyncadd [#allocation5], 4294967280 }
 0x12c   :  { %506 = vsyncpa [#allocation4], 1 }
 0x12d   :  { %507 = vsyncpa [#allocation5], 1 }

</bundles_post_ra>
